<compile_context>
chip_gen: v7x
topology: tpu7x:2x2x1
jax: 0.10.0
libtpu: 0.0.40
codegen_flags: <defaults>
</compile_context>

<pallas_src>
import functools
import math

import jax
import jax.numpy as jnp
from jax.experimental import pallas as pl
from jax.experimental.pallas import tpu as pltpu

_LANE = 128


def _round_up(a: int, b: int) -> int:
    return (a + b - 1) // b * b


def _cdiv(a: int, b: int) -> int:
    return (a + b - 1) // b


def _pos_enc_kernel(x_ref, pe_ref, o_ref, *, scale):
    # Pure VPU elementwise: scale embeddings, add the positional row
    # (pe (1, TL) broadcasts over the batch-row axis).  f32 compute in-vreg,
    # single cast at the store.
    x = x_ref[...].astype(jnp.float32)
    pe = pe_ref[...].astype(jnp.float32)
    o_ref[...] = (x * scale + pe).astype(o_ref.dtype)


def make_sincos_table(max_length: int, d_model: int, dtype=jnp.float32):
    """Precompute the (1, max_length, d_model) sin/cos table (plain JAX glue)."""
    position = jnp.arange(max_length, dtype=jnp.float32)[:, None]            # (L, 1)
    div_term = jnp.exp(
        jnp.arange(0, d_model, 2, dtype=jnp.float32)
        * (-math.log(10000.0) / d_model)
    )                                                                         # (D/2,)
    angles = position * div_term                                              # (L, D/2)
    pe = jnp.zeros((max_length, d_model), dtype=jnp.float32)
    pe = pe.at[:, 0::2].set(jnp.sin(angles))
    pe = pe.at[:, 1::2].set(jnp.cos(angles))
    return pe[None].astype(dtype)                                             # (1, L, D)


def positional_encoding(
    x: jax.Array,
    pe: jax.Array,
    *,
    row_block: int = 256,            # batch rows per tile (multiple of 8 when tiling B)
    col_block: int = 4096,           # flattened (S*D) columns per tile (multiple of 128)
    min_kernel_elements: int = 1 << 15,   # below this, use the fused-XLA fast path
) -> jax.Array:
    """x: (B, S, D); pe: (1, max_length, D) f32 table. Returns (B, S, D)."""
    B, S, D = x.shape
    max_length = pe.shape[1]
    if S > max_length:
        raise ValueError(
            f"[PositionalEncoding] max_length={max_length} < seq_len={S}"
        )
    scale = float(math.sqrt(D))
    out_dtype = jnp.result_type(x.dtype, pe.dtype)   # match torch type promotion

    # Small-input fast path: pallas_call launch overhead dominates tiny shapes.
    if B * S * D < min_kernel_elements:
        out = x.astype(jnp.float32) * scale + pe[:, :S, :].astype(jnp.float32)
        return out.astype(out_dtype)

    # ---- lane-dense 2-D view, no padding / no pe slice --------------------
    L = S * D
    x2 = x.reshape(B, L)                           # free contiguous collapse
    pe_flat = pe.reshape(1, max_length * D)        # same column offsets as x2 for cols < L

    # Row (batch) tile: full B when small (full-dim blocks have no sublane
    # divisibility constraint), otherwise a multiple-of-8 tile; partial edge
    # blocks are masked by Pallas (no padding needed).
    if B <= row_block:
        TB = B
    else:
        TB = _round_up(min(row_block, B), 8)
    n_b = _cdiv(B, TB)

    # Column (lane) tile: multiple of 128 (or full dim when tiny), sized so a
    # few balanced tiles cover L.  If the batch axis has a single step, force
    # >= 2 column tiles so both TensorCores get work on multi-TC chips.
    if L <= _LANE:
        TL = L
        n_col = 1
    else:
        n_col = max(1, _cdiv(L, col_block))
        if n_b == 1 and n_col == 1 and L > 2 * _LANE:
            n_col = 2
        TL = _round_up(_cdiv(L, n_col), _LANE)
        n_col = _cdiv(L, TL)

    # Columns outer, batch innermost -> pe block index is constant across
    # consecutive batch steps, so its DMA is skipped (fetched once per col tile).
    grid = (n_col, n_b)

    # ---- VMEM accounting (sublane-padding aware, double-buffered) ---------
    x_item = jnp.dtype(x.dtype).itemsize
    pe_item = jnp.dtype(pe.dtype).itemsize
    o_item = jnp.dtype(out_dtype).itemsize

    def _tile_bytes(rows: int, item: int) -> int:
        sublane_mult = max(1, 32 // item)          # 8 f32 / 16 bf16 / 32 int8
        return _round_up(max(rows, 1), sublane_mult) * TL * item

    working = 2 * (
        _tile_bytes(TB, x_item) + _tile_bytes(TB, o_item) + _tile_bytes(1, pe_item)
    )

    try:  # generation-aware cap: physical VMEM minus headroom, <= 100 MiB
        phys_vmem = int(getattr(pltpu.get_tpu_info(), "vmem_capacity_bytes", 64 << 20))
    except Exception:
        phys_vmem = 64 << 20
    cap = max(32 << 20, min(phys_vmem - (16 << 20), 100 << 20))
    vmem_limit = int(min(max(working + (16 << 20), 32 << 20), cap))

    cost = pl.CostEstimate(
        flops=2 * B * L,
        transcendentals=0,
        bytes_accessed=B * L * (x_item + o_item) + L * pe_item,
    )

    kernel = functools.partial(_pos_enc_kernel, scale=scale)

    out2 = pl.pallas_call(
        kernel,
        out_shape=jax.ShapeDtypeStruct((B, L), out_dtype),
        grid_spec=pltpu.PrefetchScalarGridSpec(
            num_scalar_prefetch=0,
            grid=grid,
            in_specs=[
                pl.BlockSpec((TB, TL), lambda c, b: (b, c)),
                pl.BlockSpec((1, TL), lambda c, b: (0, c)),   # ignores b -> reused
            ],
            out_specs=pl.BlockSpec((TB, TL), lambda c, b: (b, c)),
        ),
        compiler_params=pltpu.CompilerParams(
            dimension_semantics=("parallel", "parallel"),
            vmem_limit_bytes=vmem_limit,
        ),
        cost_estimate=cost,
    )(x2, pe_flat)

    return out2.reshape(B, S, D)


if __name__ == "__main__":
    # Small, module-consistent shapes: batch=2, seq=8, d_model=32
    B, S, D = 2, 8, 32
    MAX_LENGTH = 64

    key = jax.random.PRNGKey(0)
    x = jax.random.normal(key, (B, S, D), dtype=jnp.float32)
    pe = make_sincos_table(MAX_LENGTH, D)          # deterministic "buffer" init

    # min_kernel_elements=0 forces the Pallas kernel path (otherwise the tiny
    # demo shape would take the fused-XLA fast path).
    out = positional_encoding(x, pe, min_kernel_elements=0)
    out = jax.block_until_ready(out)

    ref = x * math.sqrt(D) + pe[:, :S, :]
    assert out.shape == (B, S, D)
    assert out.dtype == ref.dtype
    assert jnp.allclose(out, ref, atol=1e-5, rtol=1e-5)

    # Non-tile-aligned shape: exercises masked edge blocks (no pad/slice copies).
    B2, S2, D2 = 3, 25, 48
    x_b = jax.random.normal(jax.random.PRNGKey(0), (B2, S2, D2), dtype=jnp.float32)
    pe_b = make_sincos_table(MAX_LENGTH, D2)
    out_b = jax.block_until_ready(positional_encoding(x_b, pe_b, min_kernel_elements=0))
    ref_b = x_b * math.sqrt(D2) + pe_b[:, :S2, :]
    assert out_b.shape == (B2, S2, D2)
    assert jnp.allclose(out_b, ref_b, atol=1e-5, rtol=1e-5)

    print("KERNEL_OK")
</pallas_src>

<mosaic_0001>
module attributes {stable_mosaic.version = 11 : i64} {
  func.func @_pos_enc_kernel(%arg0: i32, %arg1: i32, %arg2: memref<2x256xf32, #tpu.memory_space<vmem>>, %arg3: memref<1x256xf32, #tpu.memory_space<vmem>>, %arg4: memref<2x256xf32, #tpu.memory_space<vmem>>) attributes {dimension_semantics = [#tpu.dimension_semantics<parallel>, #tpu.dimension_semantics<parallel>], iteration_bounds = array<i64: 1, 1>, scalar_prefetch = 0 : i64, scratch_operands = 0 : i64, tpu.core_type = #tpu.core_type<tc>, window_params = [{transform_indices = @transform_0, window_bounds = array<i64: 2, 256>}, {transform_indices = @transform_1, window_bounds = array<i64: 1, 256>}, {transform_indices = @transform_2, window_bounds = array<i64: 2, 256>}]} {
    %c0 = arith.constant 0 : index
    %c0_0 = arith.constant 0 : index
    %0 = vector.load %arg2[%c0, %c0_0] : memref<2x256xf32, #tpu.memory_space<vmem>>, vector<2x256xf32>
    %c0_1 = arith.constant 0 : index
    %c0_2 = arith.constant 0 : index
    %1 = vector.load %arg3[%c0_1, %c0_2] : memref<1x256xf32, #tpu.memory_space<vmem>>, vector<1x256xf32>
    %cst = arith.constant 5.65685415 : f32
    %2 = vector.broadcast %cst : f32 to vector<2x256xf32>
    %3 = arith.mulf %0, %2 : vector<2x256xf32>
    %4 = vector.broadcast %1 : vector<1x256xf32> to vector<2x256xf32>
    %5 = arith.addf %3, %4 : vector<2x256xf32>
    %c0_3 = arith.constant 0 : index
    %c0_4 = arith.constant 0 : index
    %6 = vector.load %arg4[%c0_3, %c0_4] : memref<2x256xf32, #tpu.memory_space<vmem>>, vector<2x256xf32>
    tpu.vector_store %arg4[%c0_3, %c0_4], %5 {strides = array<i32>} : memref<2x256xf32, #tpu.memory_space<vmem>>, vector<2x256xf32>,
    return
  }
  func.func @transform_0(%arg0: i32, %arg1: i32) -> (i32, i32) {
    %c0_i32 = arith.constant 0 : i32
    return %arg1, %arg0 : i32, i32
  }
  func.func @transform_1(%arg0: i32, %arg1: i32) -> (i32, i32) {
    %c0_i32 = arith.constant 0 : i32
    %c0_i32_0 = arith.constant 0 : i32
    return %c0_i32, %arg0 : i32, i32
  }
  func.func @transform_2(%arg0: i32, %arg1: i32) -> (i32, i32) {
    %c0_i32 = arith.constant 0 : i32
    return %arg1, %arg0 : i32, i32
  }
}

</mosaic_0001>

<bundles_post_ra>
// kernel: tpu_custom_call.1
= control target key start
LH: loop header
LB: loop body
LE: loop exit
PB: predicated region body
PF: predicated region fallthrough
CT: control target
= control target key end

     0   :  { %7 = vsyncpa [#allocation3], 0  ;;  %s216_s0 = inlined_call_operand.hbm [shape: f32[2,256], index: 0, kind: input, shape index: {}]   ;;  %s217_s1 = inlined_call_operand.hbm [shape: f32[1,2048], index: 1, kind: input, shape index: {}]   ;;  %s218_s2 = inlined_call_operand.hbm [shape: f32[2,256], index: 2, kind: output, shape index: {}]  }
   0x1   :  { %8 = vsyncpa [#allocation6], 0 }
   0x2   :  { %9 = vsyncpa [#allocation4], 0  ;;  %s151_s9 = smov [#allocation2]   ;;  %s152_s11 = smov [#allocation5]  }
   0x3   :  { %s16_s10 = sshll.u32 %s151_s9, 4  ;;  %s26_s12 = sshll.u32 %s152_s11, 4  ;;  %s17_s10 = int_to_ptr.vmem [resolvable:$true] %s16_s10  ;;  %s170_s12 = int_to_ptr.vmem [resolvable:$true] %s26_s12 }
   0x4   :  { %s79_s15 = scalar_lea.hbm %s216_s0, 64 }
   0x5   :  { %p80_p0 = scmp.ne.s32.totalorder %s216_s0, %s79_s15  ;;  %p83_p1 = scmp.lt.u32.totalorder %s79_s15, %s216_s0 }
   0x7   :  { %p85_p2 = pnand %p83_p1, %p80_p0 }
   0x9   :  { %88 = shalt.err (!%p85_p2)
}
   0xa   :  { %s89_s20 = scalar_lea.vmem %s17_s10, 64  ;;  %p94_p4 = scmp.lt.s32.totalorder %s17_s10, %s17_s10 }
   0xb   :  { %p90_p3 = scmp.ne.s32.totalorder %s17_s10, %s89_s20  ;;  %p95_p5 = scmp.lt.s32.totalorder %s89_s20, %s89_s20 }
   0xd   :  { %p96_p6 = por %p95_p5, %p94_p4 }
   0xf   :  { %p97_p7 = pnand %p96_p6, %p90_p3 }
  0x11   :  { %100 = shalt.err (!%p97_p7)
}
  0x12   :  { %19 = dma.hbm_to_vmem [thread:$0]  %s216_s0, 64, %s17_s10, [#allocation3]  }
  0x13   :  { %s101_s25 = scalar_lea.hbm %s217_s1, 32  ;;  %s103_s30 = scalar_lea.hbm %s217_s1, 256 }
  0x14   :  { %p102_p8 = scmp.ne.s32.totalorder %s217_s1, %s101_s25  ;;  %p104_p9 = scmp.lt.u32.totalorder %s103_s30, %s101_s25 }
  0x15   :  { %p105_p10 = scmp.lt.u32.totalorder %s101_s25, %s217_s1 }
  0x17   :  { %p106_p11 = por %p105_p10, %p104_p9 }
  0x19   :  { %p107_p12 = pnand %p106_p11, %p102_p8 }
  0x1b   :  { %110 = shalt.err (!%p107_p12)
}
  0x1c   :  { %s111_s0 = scalar_lea.vmem %s170_s12, 32  ;;  %p116_p0 = scmp.lt.s32.totalorder %s170_s12, %s170_s12 }
  0x1d   :  { %p112_p13 = scmp.ne.s32.totalorder %s170_s12, %s111_s0  ;;  %p117_p1 = scmp.lt.s32.totalorder %s111_s0, %s111_s0 }
  0x1f   :  { %p118_p2 = por %p117_p1, %p116_p0 }
  0x21   :  { %p119_p3 = pnand %p118_p2, %p112_p13 }
  0x23   :  { %122 = shalt.err (!%p119_p3)
}
  0x24   :  { %29 = dma.hbm_to_vmem [thread:$0]  %s217_s1, 32, %s170_s12, [#allocation6]  }
  0x25   :  { %145 = dma.done.wait [#allocation3], 64  }
  0x26   :  { %146 = vsyncadd [#allocation3], 4294967232 }
  0x27   :  { %147 = dma.done.wait [#allocation6], 32  }
  0x28   :  { %148 = vsyncadd [#allocation6], 4294967264  ;;  %v40_v0 = vlaneseq  ;;  %v153_v1 = vmov 1983009808   ;;  %v36_v7 = vld [vmem:[#allocation2] sm:$0xf] }
  0x29   :  { %v50_v2 = vunpack.c.l.s4 %v153_v1  ;;  %v37_v8 = vld [vmem:[#allocation5] sm:$0x3]  ;;  %v38_v12 = vmul.f32 5.656854, %v36_v7  ;;  %s154_s7 = smov [#allocation7]  }
  0x2a   :  { %v41_v3 = vshrl.u32 %v40_v0, 7  ;;  %s65_s1 = sshll.u32 %s154_s7, 4  ;;  %s66_s1 = int_to_ptr.vmem [resolvable:$true] %s65_s1 }
  0x2b   :  { %v51_v6 = vunpack.c.0.s8 %v50_v2  ;;  %s123_s8 = scalar_lea.vmem %s66_s1, 64  ;;  %p128_p5 = scmp.lt.s32.totalorder %s66_s1, %s66_s1 }
  0x2c   :  { %v42_v4 = vsub.s32 0, %v41_v3  ;;  %v46_v5 = vsub.s32 1, %v41_v3  ;;  %p124_p4 = scmp.ne.s32.totalorder %s66_s1, %s123_s8  ;;  %p129_p6 = scmp.lt.s32.totalorder %s123_s8, %s123_s8 }
  0x2d   :  { %v54_v11 = vsub.s32 %v51_v6, %v41_v3 }
  0x2e   :  { %v43_v9 = vrot.slane %v37_v8, %v42_v4  ;;  %v47_v10 = vrot.slane %v37_v8, %v46_v5  ;;  %p130_p7 = por %p129_p6, %p128_p5 }
  0x30   :  { %v48_v13 = vcombine.low %v43_v9, %v47_v10  ;;  %p131_p8 = pnand %p130_p7, %p124_p4 }
  0x32   :  { %v55_v14 = vrot.slane %v48_v13, %v54_v11 }
  0x34   :  { %v57_v15 = vadd.f32 %v55_v14, %v38_v12 }
  0x36   :  { %58 = vst [vmem:[#allocation7] sm:$0xf] %v57_v15 }
  0x37   :  { %134 = shalt.err (!%p131_p8)
}
  0x38   :  { %s135_s11 = scalar_lea.hbm %s218_s2, 64 }
  0x39   :  { %p136_p9 = scmp.ne.s32.totalorder %s218_s2, %s135_s11  ;;  %p139_p10 = scmp.lt.u32.totalorder %s135_s11, %s218_s2 }
  0x3b   :  { %p141_p11 = pnand %p139_p10, %p136_p9 }
  0x3d   :  { %144 = shalt.err (!%p141_p11)
}
  0x3e   :  { %68 = dma.vmem_to_hbm [thread:$0]  %s66_s1, 64, %s218_s2, [#allocation4]  }
  0x3f   :  { %149 = dma.done.wait [#allocation4], 64  }
  0x40   :  { %150 = vsyncadd [#allocation4], 4294967232 }
  0x41   :  { %72 = vsyncpa [#allocation3], 1 }
  0x42   :  { %73 = vsyncpa [#allocation6], 1 }
  0x43   :  { %74 = vsyncpa [#allocation4], 1 }

</bundles_post_ra>
